<compile_context>
chip_gen: v6e
topology: v6e:2x2x1
jax: 0.10.0
libtpu: 0.0.40
codegen_flags: <defaults>
</compile_context>

<pallas_src>
import jax
import jax.numpy as jnp
from jax.experimental import pallas as pl
from jax.experimental.pallas import tpu as pltpu


def _conv_gemm_kernel(b_ref, w_ref, bias_ref, o_ref):
    # Single MXU matmul per grid step + VPU bias add; output block is lane-dense.
    acc = jnp.dot(w_ref[...], b_ref[...], preferred_element_type=jnp.float32)
    o_ref[...] = acc + bias_ref[...]


def conv2d_pallas(x, weight, bias, *, stride=(1, 2), padding=(2, 1), dilation=(1, 3), tm=512):
    """x: [N, Cin, H, W] (NCHW), weight: [Cout, Cin, KH, KW], bias: [Cout]."""
    N, C, H, W = x.shape
    OC, _, KH, KW = weight.shape
    sh, sw = stride
    ph, pw = padding
    dh, dw = dilation
    assert sh == 1 and dh == 1, "height-shift im2col trick assumes stride_h=1, dilation_h=1"

    Hout = (H + 2 * ph - dh * (KH - 1) - 1) // sh + 1
    Wout = (W + 2 * pw - dw * (KW - 1) - 1) // sw + 1
    Hp, Wp = H + 2 * ph, W + 2 * pw

    # Zero padding (padding_mode='zeros').
    xp = jnp.pad(x, ((0, 0), (0, 0), (ph, ph), (pw, pw)))          # (N, C, Hp, Wp)

    # --- im2col via cheap static slices (no advanced-indexing gather, no 6-D transpose) ---
    # TODO(synk): the stride-2 width tap extraction stays as XLA static slices; an in-kernel
    # version would need strided lane loads / in-kernel reshapes that risk Mosaic relayouts.
    cols = [xp[:, :, :, kw * dw : kw * dw + sw * (Wout - 1) + 1 : sw] for kw in range(KW)]
    xw = jnp.stack(cols, axis=1)                                   # (N, KW, C, Hp, Wout)
    xw = xw.reshape(N, KW * C, Hp * Wout)                          # contiguous flatten of (Hp, Wout)

    Mn = Hout * Wout
    # Height taps: stride_h=1, dil_h=1 => tap kh is a contiguous window offset by kh*Wout.
    rows = [xw[:, :, kh * Wout : kh * Wout + Mn] for kh in range(KH)]   # each (N, KW*C, Mn)
    B = jnp.stack(rows, axis=1)                                    # (N, KH, KW*C, Mn)
    B = B.transpose(1, 2, 0, 3).reshape(KH * KW * C, N * Mn)       # rows (kh,kw,c), cols (n,oh,ow)

    # --- pad to MXU/vreg-friendly shapes, cast operands to bf16 (accumulate in f32) ---
    K = KH * KW * C
    M = N * Mn
    Kp = -(-K // 8) * 8            # 36 -> 40   (sublane aligned)
    Mp = -(-M // 128) * 128        # 442 -> 512 (lane-dense output)
    OCp = 8                        # 5 -> 8

    B = jnp.pad(B, ((0, Kp - K), (0, Mp - M))).astype(jnp.bfloat16)          # (Kp, Mp)
    Wm = weight.transpose(2, 3, 1, 0).reshape(K, OC).T                       # (OC, K), rows match B
    Wm = jnp.pad(Wm, ((0, OCp - OC), (0, Kp - K))).astype(jnp.bfloat16)      # (OCp, Kp)
    b2 = jnp.pad(bias, (0, OCp - OC)).astype(jnp.float32).reshape(OCp, 1)    # (OCp, 1)

    # Grid over the M (lane) dimension: grid=(1,) at this size, but the structure lets
    # megacore (v7x, 2 TCs) shard M blocks when scaled up. VMEM use here is ~100 KB,
    # well under the v7x 32 MiB scoped budget.
    tm = min(tm, Mp)
    assert Mp % tm == 0

    out2d = pl.pallas_call(
        _conv_gemm_kernel,
        out_shape=jax.ShapeDtypeStruct((OCp, Mp), jnp.float32),
        grid_spec=pl.GridSpec(
            grid=(Mp // tm,),
            in_specs=[
                pl.BlockSpec((Kp, tm), lambda i: (0, i)),      # im2col matrix, blocked over M
                pl.BlockSpec((OCp, Kp), lambda i: (0, 0)),     # weights (resident)
                pl.BlockSpec((OCp, 1), lambda i: (0, 0)),      # bias (resident)
            ],
            out_specs=pl.BlockSpec((OCp, tm), lambda i: (0, i)),
        ),
        compiler_params=pltpu.CompilerParams(
            dimension_semantics=("parallel",),
            vmem_limit_bytes=32 * 1024 * 1024,
        ),
    )(B, Wm, b2)

    # [OC, N*Hout*Wout] -> NCHW. Slice off padding; the reshape is contiguous and the
    # transpose only swaps a size-1 batch dim (free) -- no spatial relayout.
    out = out2d[:OC, :M].reshape(OC, N, Hout, Wout).transpose(1, 0, 2, 3)
    return out


if __name__ == "__main__":
    key = jax.random.PRNGKey(0)
    kx, kw, kb = jax.random.split(key, 3)

    # Input shape from ConvModule.input_shapes(): (1, 3, 32, 32), NCHW.
    x = jax.random.normal(kx, (1, 3, 32, 32), dtype=jnp.float32)
    # Conv2d(3 -> 5, kernel=(3,4)) parameters, deterministic init.
    fan_in = 3 * 3 * 4
    bound = 1.0 / (fan_in ** 0.5)
    weight = jax.random.uniform(kw, (5, 3, 3, 4), jnp.float32, -bound, bound)
    bias = jax.random.uniform(kb, (5,), jnp.float32, -bound, bound)

    conv = jax.jit(conv2d_pallas)
    out = conv(x, weight, bias)
    out = jax.block_until_ready(out)

    # Sanity check vs XLA's native dilated conv (same semantics as torch Conv2d).
    ref = jax.lax.conv_general_dilated(
        x, weight,
        window_strides=(1, 2),
        padding=((2, 2), (1, 1)),
        rhs_dilation=(1, 3),
        dimension_numbers=("NCHW", "OIHW", "NCHW"),
    ) + bias[None, :, None, None]

    assert out.shape == (1, 5, 34, 13), out.shape
    # bf16 operands (f32 accumulation): loosen tolerance accordingly.
    assert jnp.allclose(out, ref, atol=2e-2, rtol=2e-2), "mismatch vs reference conv"

    print("KERNEL_OK")
</pallas_src>

<mosaic_0001>
module attributes {stable_mosaic.version = 11 : i64} {
  func.func @_conv_gemm_kernel(%arg0: i32, %arg1: memref<40x512xbf16, #tpu.memory_space<vmem>>, %arg2: memref<8x40xbf16, #tpu.memory_space<vmem>>, %arg3: memref<8x1xf32, #tpu.memory_space<vmem>>, %arg4: memref<8x512xf32, #tpu.memory_space<vmem>>) attributes {dimension_semantics = [#tpu.dimension_semantics<parallel>], iteration_bounds = array<i64: 1>, scalar_prefetch = 0 : i64, scratch_operands = 0 : i64, tpu.core_type = #tpu.core_type<tc>, window_params = [{transform_indices = @transform_0, window_bounds = array<i64: 40, 512>}, {pipeline_mode = #tpu.pipeline_mode<synchronous>, transform_indices = @transform_1, window_bounds = array<i64: 8, 40>}, {pipeline_mode = #tpu.pipeline_mode<synchronous>, transform_indices = @transform_2, window_bounds = array<i64: 8, 1>}, {transform_indices = @transform_3, window_bounds = array<i64: 8, 512>}]} {
    %c0 = arith.constant 0 : index
    %c0_0 = arith.constant 0 : index
    %0 = vector.load %arg2[%c0, %c0_0] : memref<8x40xbf16, #tpu.memory_space<vmem>>, vector<8x40xbf16>
    %c0_1 = arith.constant 0 : index
    %c0_2 = arith.constant 0 : index
    %1 = vector.load %arg1[%c0_1, %c0_2] : memref<40x512xbf16, #tpu.memory_space<vmem>>, vector<40x512xbf16>
    %cst = arith.constant dense<0.000000e+00> : vector<8x512xf32>
    %2 = tpu.matmul %0, %1, %cst {dimension_numbers = #tpu.dot_dimension_numbers<[1], [0], [0], [1], [0, 0, 1, 1], [], []>} : vector<8x40xbf16>, vector<40x512xbf16>, vector<8x512xf32> -> vector<8x512xf32>
    %c0_3 = arith.constant 0 : index
    %c0_4 = arith.constant 0 : index
    %3 = vector.load %arg3[%c0_3, %c0_4] : memref<8x1xf32, #tpu.memory_space<vmem>>, vector<8x1xf32>
    %4 = vector.broadcast %3 : vector<8x1xf32> to vector<8x512xf32>
    %5 = arith.addf %2, %4 : vector<8x512xf32>
    %c0_5 = arith.constant 0 : index
    %c0_6 = arith.constant 0 : index
    %6 = vector.load %arg4[%c0_5, %c0_6] : memref<8x512xf32, #tpu.memory_space<vmem>>, vector<8x512xf32>
    tpu.vector_store %arg4[%c0_5, %c0_6], %5 {strides = array<i32>} : memref<8x512xf32, #tpu.memory_space<vmem>>, vector<8x512xf32>,
    return
  }
  func.func @transform_0(%arg0: i32) -> (i32, i32) {
    %c0_i32 = arith.constant 0 : i32
    %c0_i32_0 = arith.constant 0 : i32
    return %c0_i32, %arg0 : i32, i32
  }
  func.func @transform_1(%arg0: i32) -> (i32, i32) {
    %c0_i32 = arith.constant 0 : i32
    %c0_i32_0 = arith.constant 0 : i32
    %c0_i32_1 = arith.constant 0 : i32
    return %c0_i32, %c0_i32_0 : i32, i32
  }
  func.func @transform_2(%arg0: i32) -> (i32, i32) {
    %c0_i32 = arith.constant 0 : i32
    %c0_i32_0 = arith.constant 0 : i32
    %c0_i32_1 = arith.constant 0 : i32
    return %c0_i32, %c0_i32_0 : i32, i32
  }
  func.func @transform_3(%arg0: i32) -> (i32, i32) {
    %c0_i32 = arith.constant 0 : i32
    %c0_i32_0 = arith.constant 0 : i32
    return %c0_i32, %arg0 : i32, i32
  }
}

</mosaic_0001>

<bundles_post_ra>
// kernel: conv2d_pallas.1
= control target key start
LH: loop header
LB: loop body
LE: loop exit
PB: predicated region body
PF: predicated region fallthrough
CT: control target
= control target key end

     0   :  { %vm86_vm0 = vcmask 1043456   ;;  %v223_v2 = vmov 0   ;;  %vm82_vm1 = vcmask 326656   ;;  %s292_s0 = inlined_call_operand.vmem [shape: bf16[40,512], index: 0, kind: input, shape index: {}]   ;;  %s293_s2 = inlined_call_operand.vmem [shape: f32[8,1], index: 2, kind: input, shape index: {}]   ;;  %s294_s1 = inlined_call_operand.vmem [shape: bf16[8,40], index: 1, kind: input, shape index: {}]   ;;  %s295_s3 = inlined_call_operand.vmem [shape: f32[8,512], index: 3, kind: output, shape index: {}]  }
   0x1   :  { %v24_v0 = vld [vmem:[%s292_s0 + $0x40] sm:$0xff]  ;;  %v25_v1 = vld [vmem:[%s292_s0 + $0x48] sm:$0xff]  ;;  %131 = vmatprep.mubr.bf16.mxu0 %v223_v2  ;;  %172 = vmatprep.mubr.bf16.mxu1 %v223_v2 }
   0x2   :  { %v198_v3 = vcombine.high %v24_v0, %v24_v0  ;;  %v200_v4 = vcombine.high %v25_v1, %v25_v1  ;;  %v197_v5 = vcombine.low %v24_v0, %v24_v0  ;;  %v199_v6 = vcombine.low %v25_v1, %v25_v1  ;;  %v211_v7 = vld [vmem:[%s292_s0 + $0x24] ss:$16 sps:$4 sm:$0xff]   ;;  %206 = vset.pattern.permute.xlu0 %v223_v2  ;;  %v213_v8 = vld [vmem:[%s292_s0 + $0x2c] ss:$16 sps:$4 sm:$0xff]   ;;  %v215_v11 = vld [vmem:[%s292_s0 + $0x20] ss:$16 sps:$4 sm:$0xff]  }
   0x3   :  { %v216_v12 = vld [vmem:[%s292_s0 + $0x28] ss:$16 sps:$4 sm:$0xff]   ;;  %v217_v13 = vld [vmem:[%s292_s0 + $0x4] ss:$16 sps:$4 sm:$0xff]   ;;  %v219_v14 = vld [vmem:[%s292_s0 + $0xc] ss:$16 sps:$4 sm:$0xff]  }
   0x4   :  { %201 = vmatprep.subr.msk.bf16.mxu0 %vm86_vm0, %v198_v3  ;;  %203 = vmatprep.subr.msk.bf16.mxu1 %vm86_vm0, %v200_v4  ;;  %v88_v9 = vsel %vm86_vm0, %v197_v5, 0  ;;  %v94_v10 = vsel %vm86_vm0, %v199_v6, 0  ;;  %v26_v15 = vld [vmem:[%s293_s2] sm:$0xff]  ;;  %v222_v17 = vld [vmem:[%s292_s0 + $0x8] ss:$16 sps:$4 sm:$0xff]  }
   0x5   :  { %110 = vmatpush1.bf16.msra.mxu0 %v88_v9  ;;  %151 = vmatpush1.bf16.msra.mxu1 %v94_v10  ;;  %v221_v16 = vld [vmem:[%s292_s0] ss:$16 sps:$4 sm:$0xff]  }
   0x6   :  { %111 = vmatprep.subr.bf16.mxu0 %v211_v7  ;;  %152 = vmatprep.subr.bf16.mxu1 %v213_v8  ;;  %v15_v18 = vld [vmem:[%s294_s1] sm:$0xf] }
   0x7   :  { %29 = vperm.xlu0 %206, %v26_v15  }
   0x9   :  { %112 = vmatpush1.bf16.msra.mxu0 %v215_v11  ;;  %153 = vmatpush1.bf16.msra.mxu1 %v216_v12 }
   0xa   :  { %113 = vmatprep.subr.bf16.mxu0 %v217_v13  ;;  %154 = vmatprep.subr.bf16.mxu1 %v219_v14 }
   0xd   :  { %114 = vmatpush1.bf16.msra.mxu0 %v221_v16  ;;  %155 = vmatpush1.bf16.msra.mxu1 %v222_v17 }
  0x10   :  { %202 = vmatmul.mubr.msk.bf16.vlgmr.msra.gmra.mxu0 %vm82_vm1, %v15_v18  ;;  %204 = vmatmul.mubr.msk.bf16.vlgmr.msra.gmra.mxu1 %vm82_vm1, %v15_v18 }
  0x82   :  { %v30_v19 = vpop.permute.xlu0 %29 }
  0xd0   :  { %v133_v20 = vpop.f32.mrf.mxu0  ;;  %v174_v21 = vpop.f32.mrf.mxu1 }
  0xd1   :  { %v134_v22 = vadd.f32 %v133_v20, %v30_v19  ;;  %v175_v23 = vadd.f32 %v174_v21, %v30_v19 }
  0xd2   :  { %v135_v24 = vpop.f32.mrf.mxu0  ;;  %v176_v25 = vpop.f32.mrf.mxu1 }
  0xd3   :  { %181 = vst [vmem:[%s295_s3] sm:$0xff] %v134_v22  ;;  %183 = vst [vmem:[%s295_s3 + $0x10] sm:$0xff] %v175_v23  ;;  %v136_v26 = vadd.f32 %v135_v24, %v30_v19  ;;  %v177_v27 = vadd.f32 %v176_v25, %v30_v19 }
  0xd4   :  { %v137_v28 = vpop.f32.mrf.mxu0  ;;  %v178_v29 = vpop.f32.mrf.mxu1 }
  0xd5   :  { %182 = vst [vmem:[%s295_s3 + $0x8] sm:$0xff] %v136_v26  ;;  %184 = vst [vmem:[%s295_s3 + $0x18] sm:$0xff] %v177_v27 }
  0xd6   :  { %v138_v30 = vpop.f32.mrf.mxu0  ;;  %v179_v31 = vpop.f32.mrf.mxu1 }

</bundles_post_ra>
